<compile_context>
chip_gen: v6e
topology: v6e:2x2x1
jax: 0.10.0
libtpu: 0.0.40
codegen_flags: <defaults>
</compile_context>

<pallas_src>
import functools

import jax
import jax.numpy as jnp
from jax.experimental import pallas as pl
from jax.experimental.pallas import tpu as pltpu

N_HIDDEN_LAYERS = 3
HIDDEN_DIM = 32
IN_DIM = 8
OUT_DIM = 2
LANES = 128


def mlp_kernel(x_ref, w_ref, b_ref, o_ref):
    # One MXU matmul (K = pack*in_dim = 512, N = pack*out_dim = 128) per tile,
    # then bias + ReLU on the VPU.  All I/O tiles are 128-lane dense.
    acc = jnp.dot(x_ref[...], w_ref[...], preferred_element_type=jnp.float32)
    o_ref[...] = jnp.maximum(acc + b_ref[...], 0.0).astype(o_ref.dtype)


def collapse_params(params):
    """Fold the purely-affine layer chain into one (in_dim, out_dim) weight.

    Exact because the PyTorch forward has no nonlinearity between layers
    (only a final ReLU); fp32 accumulation order is reassociated."""
    W = params["w_in"]                                  # (in, hid)
    b = params["b_in"]                                  # (1, hid)
    for i in range(params["w_h"].shape[0]):
        W = W @ params["w_h"][i]
        b = b @ params["w_h"][i] + params["b_h"][i][None, :]
    W = W @ params["w_out"]                             # (in, out)
    b = b @ params["w_out"] + params["b_out"]           # (1, out)
    return W.astype(jnp.float32), b.astype(jnp.float32)


def pack_params(params):
    """Build the lane-dense block-diagonal weight ONCE (hoisted out of the
    per-call path).  W_blk[p*in+i, q*out+o] = W_eff[i, o] * (p == q)."""
    w_eff, b_eff = collapse_params(params)
    in_dim, out_dim = int(w_eff.shape[0]), int(w_eff.shape[1])
    pack = max(1, LANES // out_dim)                     # 64 rows -> 128-lane output
    eye = jnp.eye(pack, dtype=w_eff.dtype)
    w_blk = (eye[:, None, :, None] * w_eff[None, :, None, :]).reshape(
        pack * in_dim, pack * out_dim)                  # (512, 128)
    b_blk = jnp.tile(b_eff, (1, pack))                  # (1, 128), [b0,b1,b0,b1,...]
    return w_blk, b_blk, pack, in_dim, out_dim


@functools.partial(
    jax.jit, static_argnames=("pack", "in_dim", "out_dim", "block_packed"))
def mlp_forward_packed(x, w_blk, b_blk, *, pack, in_dim, out_dim,
                       block_packed=2048):
    """x: (B, in_dim) float32.  w_blk/b_blk from pack_params (precomputed)."""
    B = x.shape[0]

    # Pad only to a multiple of `pack` (<= pack-1 rows), never to the tile size.
    b_pad = pl.cdiv(B, pack) * pack
    if b_pad != B:
        x = jnp.pad(x, ((0, b_pad - B), (0, 0)))
    n_packed = b_pad // pack
    xp = x.reshape(n_packed, pack * in_dim)             # free row-major reshape

    # Tile selection: big tiles for step-overhead amortization; when the whole
    # batch fits in one tile but there is enough work, split into >= 2 tiles so
    # v7x's second TensorCore is used (no-op on single-TC v5e/v6e).
    if n_packed <= block_packed:
        if n_packed >= 16:
            tb = ((pl.cdiv(n_packed, 2) + 7) // 8) * 8  # 2 tiles, multiple of 8
        else:
            tb = n_packed                               # single full-array block
    else:
        tb = block_packed                               # multiple of 8
    grid = (pl.cdiv(n_packed, tb),)

    kin = pack * in_dim                                 # 512
    kout = pack * out_dim                               # 128
    cost = pl.CostEstimate(
        flops=2 * n_packed * kin * kout,
        transcendentals=0,
        bytes_accessed=(n_packed * kin + n_packed * kout
                        + w_blk.size + b_blk.size) * 4,
    )

    out_p = pl.pallas_call(
        mlp_kernel,
        out_shape=jax.ShapeDtypeStruct((n_packed, kout), x.dtype),
        grid=grid,
        in_specs=[
            pl.BlockSpec((tb, kin), lambda i: (i, 0)),      # packed x: batch-tiled
            pl.BlockSpec((kin, kout), lambda i: (0, 0)),    # W_blk: VMEM-resident
            pl.BlockSpec((1, kout), lambda i: (0, 0)),      # bias: VMEM-resident
        ],
        out_specs=pl.BlockSpec((tb, kout), lambda i: (i, 0)),
        compiler_params=pltpu.CompilerParams(
            dimension_semantics=("parallel",),              # megacore on v7x
        ),
        cost_estimate=cost,
    )(xp, w_blk, b_blk)

    # Row-major unflatten back to (B, out_dim); padded rows are sliced off.
    return out_p.reshape(b_pad, out_dim)[:B]


def mlp_forward(x, params, *, block_packed=2048):
    """Convenience wrapper (prefer pack_params once + mlp_forward_packed)."""
    w_blk, b_blk, pack, in_dim, out_dim = pack_params(params)
    return mlp_forward_packed(x, w_blk, b_blk, pack=pack, in_dim=in_dim,
                              out_dim=out_dim, block_packed=block_packed)


def init_params(key, n_hidden_layers=N_HIDDEN_LAYERS, hidden_dim=HIDDEN_DIM,
                in_dim=IN_DIM, out_dim=OUT_DIM):
    """Deterministic init mimicking nn.Linear's U(-1/sqrt(fan_in), 1/sqrt(fan_in)).
    Weights stored pre-transposed to (in_features, out_features)."""
    keys = jax.random.split(key, 2 * (n_hidden_layers + 2))
    ki = iter(range(len(keys)))

    def linear(fan_in, fan_out):
        bound = 1.0 / jnp.sqrt(float(fan_in))
        w = jax.random.uniform(keys[next(ki)], (fan_in, fan_out),
                               jnp.float32, -bound, bound)
        b = jax.random.uniform(keys[next(ki)], (1, fan_out),
                               jnp.float32, -bound, bound)
        return w, b

    w_in, b_in = linear(in_dim, hidden_dim)
    w_hs, b_hs = [], []
    for _ in range(n_hidden_layers):
        w, b = linear(hidden_dim, hidden_dim)
        w_hs.append(w)
        b_hs.append(b[0])
    w_out, b_out = linear(hidden_dim, out_dim)
    return {
        "w_in": w_in, "b_in": b_in,
        "w_h": jnp.stack(w_hs), "b_h": jnp.stack(b_hs),
        "w_out": w_out, "b_out": b_out,
    }


def mlp_reference(x, params):
    """Layer-by-layer reference matching the PyTorch forward exactly."""
    h = x @ params["w_in"] + params["b_in"]
    for i in range(params["w_h"].shape[0]):
        h = h @ params["w_h"][i] + params["b_h"][i][None, :]
    out = h @ params["w_out"] + params["b_out"]
    return jnp.maximum(out, 0.0)


if __name__ == "__main__":
    key = jax.random.PRNGKey(0)
    pkey, xkey1, xkey2 = jax.random.split(key, 3)
    params = init_params(pkey)

    # Hoisted once: collapsed + block-diagonal-packed parameters.
    w_blk, b_blk, pack, in_dim, out_dim = pack_params(params)
    fwd = functools.partial(mlp_forward_packed, w_blk=w_blk, b_blk=b_blk,
                            pack=pack, in_dim=in_dim, out_dim=out_dim,
                            block_packed=2048)

    # Small batch (matches the module's tiny sizes): single full-array block.
    batch = 8
    x = jax.random.normal(xkey1, (batch, IN_DIM), dtype=jnp.float32)
    out = jax.block_until_ready(fwd(x))
    ref = mlp_reference(x, params)
    assert out.shape == (batch, OUT_DIM), out.shape
    # Layer collapse reassociates fp32 ops -> allow ~1e-4 differences.
    assert jnp.allclose(out, ref, atol=1e-4, rtol=1e-4), (
        f"max abs err = {jnp.max(jnp.abs(out - ref))}")

    # Larger, non-multiple-of-64 batch: exercises tail padding, the lane-dense
    # repack, and the 2-tile "parallel" grid path.
    batch2 = 1000
    x2 = jax.random.normal(xkey2, (batch2, IN_DIM), dtype=jnp.float32)
    out2 = jax.block_until_ready(fwd(x2))
    ref2 = mlp_reference(x2, params)
    assert out2.shape == (batch2, OUT_DIM), out2.shape
    assert jnp.allclose(out2, ref2, atol=1e-4, rtol=1e-4), (
        f"max abs err = {jnp.max(jnp.abs(out2 - ref2))}")

    print("KERNEL_OK")
</pallas_src>

<mosaic_0001>
module attributes {stable_mosaic.version = 11 : i64} {
  func.func @mlp_kernel(%arg0: i32, %arg1: memref<1x512xf32, #tpu.memory_space<vmem>>, %arg2: memref<512x128xf32, #tpu.memory_space<vmem>>, %arg3: memref<1x128xf32, #tpu.memory_space<vmem>>, %arg4: memref<1x128xf32, #tpu.memory_space<vmem>>) attributes {dimension_semantics = [#tpu.dimension_semantics<parallel>], iteration_bounds = array<i64: 1>, scalar_prefetch = 0 : i64, scratch_operands = 0 : i64, tpu.core_type = #tpu.core_type<tc>, window_params = [{transform_indices = @transform_0, window_bounds = array<i64: 1, 512>}, {pipeline_mode = #tpu.pipeline_mode<synchronous>, transform_indices = @transform_1, window_bounds = array<i64: 512, 128>}, {pipeline_mode = #tpu.pipeline_mode<synchronous>, transform_indices = @transform_2, window_bounds = array<i64: 1, 128>}, {transform_indices = @transform_3, window_bounds = array<i64: 1, 128>}]} {
    %c0 = arith.constant 0 : index
    %c0_0 = arith.constant 0 : index
    %0 = vector.load %arg1[%c0, %c0_0] : memref<1x512xf32, #tpu.memory_space<vmem>>, vector<1x512xf32>
    %c0_1 = arith.constant 0 : index
    %c0_2 = arith.constant 0 : index
    %1 = vector.load %arg2[%c0_1, %c0_2] : memref<512x128xf32, #tpu.memory_space<vmem>>, vector<512x128xf32>
    %cst = arith.constant dense<0.000000e+00> : vector<1x128xf32>
    %2 = tpu.matmul %0, %1, %cst {dimension_numbers = #tpu.dot_dimension_numbers<[1], [0], [0], [1], [0, 0, 1, 1], [], []>} : vector<1x512xf32>, vector<512x128xf32>, vector<1x128xf32> -> vector<1x128xf32>
    %c0_3 = arith.constant 0 : index
    %c0_4 = arith.constant 0 : index
    %3 = vector.load %arg3[%c0_3, %c0_4] : memref<1x128xf32, #tpu.memory_space<vmem>>, vector<1x128xf32>
    %4 = arith.addf %2, %3 : vector<1x128xf32>
    %cst_5 = arith.constant 0.000000e+00 : f32
    %5 = vector.broadcast %cst_5 : f32 to vector<1x128xf32>
    %6 = arith.maximumf %4, %5 : vector<1x128xf32>
    %c0_6 = arith.constant 0 : index
    %c0_7 = arith.constant 0 : index
    %7 = vector.load %arg4[%c0_6, %c0_7] : memref<1x128xf32, #tpu.memory_space<vmem>>, vector<1x128xf32>
    tpu.vector_store %arg4[%c0_6, %c0_7], %6 {strides = array<i32>} : memref<1x128xf32, #tpu.memory_space<vmem>>, vector<1x128xf32>,
    return
  }
  func.func @transform_0(%arg0: i32) -> (i32, i32) {
    %c0_i32 = arith.constant 0 : i32
    %c0_i32_0 = arith.constant 0 : i32
    return %arg0, %c0_i32 : i32, i32
  }
  func.func @transform_1(%arg0: i32) -> (i32, i32) {
    %c0_i32 = arith.constant 0 : i32
    %c0_i32_0 = arith.constant 0 : i32
    %c0_i32_1 = arith.constant 0 : i32
    return %c0_i32, %c0_i32_0 : i32, i32
  }
  func.func @transform_2(%arg0: i32) -> (i32, i32) {
    %c0_i32 = arith.constant 0 : i32
    %c0_i32_0 = arith.constant 0 : i32
    %c0_i32_1 = arith.constant 0 : i32
    return %c0_i32, %c0_i32_0 : i32, i32
  }
  func.func @transform_3(%arg0: i32) -> (i32, i32) {
    %c0_i32 = arith.constant 0 : i32
    %c0_i32_0 = arith.constant 0 : i32
    return %arg0, %c0_i32 : i32, i32
  }
}

</mosaic_0001>

<bundles_post_ra>
// kernel: mlp_forward_packed.1
= control target key start
LH: loop header
LB: loop body
LE: loop exit
PB: predicated region body
PF: predicated region fallthrough
CT: control target
= control target key end

     0   :  { %8 = vsyncpa [#allocation3], 0  ;;  %s357_s12 = smov [#allocation2]   ;;  %s392_s0 = inlined_call_operand.vmem [shape: f32[1,512], index: 0, kind: input, shape index: {}]   ;;  %s393_s1 = inlined_call_operand.hbm [shape: f32[512,128], index: 1, kind: input, shape index: {}]   ;;  %s394_s2 = inlined_call_operand.vmem [shape: f32[1,128], index: 2, kind: input, shape index: {}]   ;;  %s395_s3 = inlined_call_operand.vmem [shape: f32[1,128], index: 3, kind: output, shape index: {}]  }
   0x1   :  { %s16_s13 = sshll.u32 %s357_s12, 4  ;;  %s17_s13 = int_to_ptr.vmem [resolvable:$true] %s16_s13 }
   0x2   :  { %s343_s14 = scalar_lea.vmem %s17_s13, 8192  ;;  %p348_p1 = scmp.lt.s32.totalorder %s17_s13, %s17_s13 }
   0x3   :  { %p344_p0 = scmp.ne.s32.totalorder %s17_s13, %s343_s14  ;;  %p349_p2 = scmp.lt.s32.totalorder %s343_s14, %s343_s14 }
   0x5   :  { %p350_p3 = por %p349_p2, %p348_p1 }
   0x7   :  { %p351_p4 = pnand %p350_p3, %p344_p0 }
   0x9   :  { %354 = shalt.err (!%p351_p4)
}
   0xa   :  { %s358_s15 = smov 128   ;;  %s359_s16 = smov 8  }
   0xb   :  { %22 = dma.hbm_to_vmem [thread:$0]  %s393_s1, 8192, %s17_s13, [#allocation3], %s358_s15, %s358_s15, %s359_s16  }
   0xc   :  { %355 = dma.done.wait [#allocation3], 8192  }
   0xd   :  { %356 = vsyncadd [#allocation3], 4294959104  ;;  %v60_v0 = vld [vmem:[#allocation2 + $0xf8] sm:$0xff]  ;;  %v59_v4 = vld [vmem:[#allocation2 + $0xf0] sm:$0xff]  ;;  %v95_v38 = vlaneseq }
   0xe   :  { %v92_v1 = vld [vmem:[#allocation2 + $0x1f8] sm:$0xff]  ;;  %262 = vmatprep.subr.mxu0 %v60_v0  ;;  %v91_v5 = vld [vmem:[#allocation2 + $0x1f0] sm:$0xff]  ;;  %v58_v8 = vld [vmem:[#allocation2 + $0xe8] sm:$0xff] }
   0xf   :  { %v44_v2 = vld [vmem:[#allocation2 + $0x78] sm:$0xff]  ;;  %297 = vmatprep.subr.mxu1 %v92_v1  ;;  %v43_v6 = vld [vmem:[#allocation2 + $0x70] sm:$0xff]  ;;  %v90_v9 = vld [vmem:[#allocation2 + $0x1e8] sm:$0xff]  ;;  %v96_v47 = vshrl.u32 %v95_v38, 7 }
  0x10   :  { %v76_v3 = vld [vmem:[#allocation2 + $0x178] sm:$0xff]  ;;  %263 = vmatpush3.msra.mxu0 %v44_v2  ;;  %v75_v7 = vld [vmem:[#allocation2 + $0x170] sm:$0xff]  ;;  %v42_v10 = vld [vmem:[#allocation2 + $0x68] sm:$0xff] }
  0x11   :  { %298 = vmatpush3.msra.mxu1 %v76_v3  ;;  %264 = vmatprep.subr.mxu0 %v59_v4  ;;  %v74_v11 = vld [vmem:[#allocation2 + $0x168] sm:$0xff]  ;;  %v57_v12 = vld [vmem:[#allocation2 + $0xe0] sm:$0xff]  ;;  %v56_v16 = vld [vmem:[#allocation2 + $0xd8] sm:$0xff]  ;;  %v101_v56 = vsub.s32 1, %v96_v47  ;;  %v109_v60 = vsub.s32 3, %v96_v47  ;;  %v97_v63 = vsub.s32 0, %v96_v47 }
  0x12   :  { %299 = vmatprep.subr.mxu1 %v91_v5  ;;  %265 = vmatpush3.msra.mxu0 %v43_v6  ;;  %v89_v13 = vld [vmem:[#allocation2 + $0x1e0] sm:$0xff]  ;;  %v88_v17 = vld [vmem:[#allocation2 + $0x1d8] sm:$0xff]  ;;  %v55_v20 = vld [vmem:[#allocation2 + $0xd0] sm:$0xff]  ;;  %v105_v0 = vsub.s32 2, %v96_v47 }
  0x13   :  { %300 = vmatpush3.msra.mxu1 %v75_v7  ;;  %266 = vmatprep.subr.mxu0 %v58_v8  ;;  %v41_v14 = vld [vmem:[#allocation2 + $0x60] sm:$0xff]  ;;  %v40_v18 = vld [vmem:[#allocation2 + $0x58] sm:$0xff]  ;;  %v87_v21 = vld [vmem:[#allocation2 + $0x1d0] sm:$0xff] }
  0x14   :  { %301 = vmatprep.subr.mxu1 %v90_v9  ;;  %v73_v15 = vld [vmem:[#allocation2 + $0x160] sm:$0xff]  ;;  %267 = vmatpush3.msra.mxu0 %v42_v10  ;;  %v72_v19 = vld [vmem:[#allocation2 + $0x158] sm:$0xff]  ;;  %v39_v22 = vld [vmem:[#allocation2 + $0x50] sm:$0xff] }
  0x15   :  { %302 = vmatpush3.msra.mxu1 %v74_v11  ;;  %268 = vmatprep.subr.mxu0 %v57_v12  ;;  %v71_v23 = vld [vmem:[#allocation2 + $0x150] sm:$0xff]  ;;  %v54_v24 = vld [vmem:[#allocation2 + $0xc8] sm:$0xff]  ;;  %v53_v28 = vld [vmem:[#allocation2 + $0xc0] sm:$0xff] }
  0x16   :  { %303 = vmatprep.subr.mxu1 %v89_v13  ;;  %269 = vmatpush3.msra.mxu0 %v41_v14  ;;  %v86_v25 = vld [vmem:[#allocation2 + $0x1c8] sm:$0xff]  ;;  %v85_v29 = vld [vmem:[#allocation2 + $0x1c0] sm:$0xff]  ;;  %v52_v32 = vld [vmem:[#allocation2 + $0xb8] sm:$0xff] }
  0x17   :  { %304 = vmatpush3.msra.mxu1 %v73_v15  ;;  %270 = vmatprep.subr.mxu0 %v56_v16  ;;  %v38_v26 = vld [vmem:[#allocation2 + $0x48] sm:$0xff]  ;;  %v37_v30 = vld [vmem:[#allocation2 + $0x40] sm:$0xff]  ;;  %v84_v33 = vld [vmem:[#allocation2 + $0x1b8] sm:$0xff] }
  0x18   :  { %305 = vmatprep.subr.mxu1 %v88_v17  ;;  %271 = vmatpush3.msra.mxu0 %v40_v18  ;;  %v70_v27 = vld [vmem:[#allocation2 + $0x148] sm:$0xff]  ;;  %v69_v31 = vld [vmem:[#allocation2 + $0x140] sm:$0xff]  ;;  %v36_v34 = vld [vmem:[#allocation2 + $0x38] sm:$0xff] }
  0x19   :  { %306 = vmatpush3.msra.mxu1 %v72_v19  ;;  %272 = vmatprep.subr.mxu0 %v55_v20  ;;  %v68_v35 = vld [vmem:[#allocation2 + $0x138] sm:$0xff]  ;;  %v51_v36 = vld [vmem:[#allocation2 + $0xb0] sm:$0xff]  ;;  %v50_v41 = vld [vmem:[#allocation2 + $0xa8] sm:$0xff] }
  0x1a   :  { %307 = vmatprep.subr.mxu1 %v87_v21  ;;  %273 = vmatpush3.msra.mxu0 %v39_v22  ;;  %v83_v37 = vld [vmem:[#allocation2 + $0x1b0] sm:$0xff]  ;;  %v82_v42 = vld [vmem:[#allocation2 + $0x1a8] sm:$0xff]  ;;  %v49_v45 = vld [vmem:[#allocation2 + $0xa0] sm:$0xff] }
  0x1b   :  { %308 = vmatpush3.msra.mxu1 %v71_v23  ;;  %274 = vmatprep.subr.mxu0 %v54_v24  ;;  %v35_v39 = vld [vmem:[#allocation2 + $0x30] sm:$0xff]  ;;  %v34_v43 = vld [vmem:[#allocation2 + $0x28] sm:$0xff]  ;;  %v81_v46 = vld [vmem:[#allocation2 + $0x1a0] sm:$0xff] }
  0x1c   :  { %309 = vmatprep.subr.mxu1 %v86_v25  ;;  %275 = vmatpush3.msra.mxu0 %v38_v26  ;;  %v67_v40 = vld [vmem:[#allocation2 + $0x130] sm:$0xff]  ;;  %v66_v44 = vld [vmem:[#allocation2 + $0x128] sm:$0xff]  ;;  %v33_v48 = vld [vmem:[#allocation2 + $0x20] sm:$0xff] }
  0x1d   :  { %310 = vmatpush3.msra.mxu1 %v70_v27  ;;  %276 = vmatprep.subr.mxu0 %v53_v28  ;;  %v65_v49 = vld [vmem:[#allocation2 + $0x120] sm:$0xff]  ;;  %v48_v50 = vld [vmem:[#allocation2 + $0x98] sm:$0xff]  ;;  %v47_v54 = vld [vmem:[#allocation2 + $0x90] sm:$0xff] }
  0x1e   :  { %311 = vmatprep.subr.mxu1 %v85_v29  ;;  %277 = vmatpush3.msra.mxu0 %v37_v30  ;;  %v80_v51 = vld [vmem:[#allocation2 + $0x198] sm:$0xff]  ;;  %v79_v55 = vld [vmem:[#allocation2 + $0x190] sm:$0xff]  ;;  %v28_v59 = vld [vmem:[%s392_s0] sm:$0xf] }
  0x1f   :  { %312 = vmatpush3.msra.mxu1 %v69_v31  ;;  %278 = vmatprep.subr.mxu0 %v52_v32  ;;  %v32_v52 = vld [vmem:[#allocation2 + $0x18] sm:$0xff]  ;;  %v31_v57 = vld [vmem:[#allocation2 + $0x10] sm:$0xff]  ;;  %v46_v61 = vld [vmem:[#allocation2 + $0x88] sm:$0xff]  ;;  %v102_v5 = vrot.slane %v28_v59, %v101_v56  ;;  %v110_v7 = vrot.slane %v28_v59, %v109_v60  ;;  %v98_v9 = vrot.slane %v28_v59, %v97_v63 }
  0x20   :  { %313 = vmatprep.subr.mxu1 %v84_v33  ;;  %279 = vmatpush3.msra.mxu0 %v36_v34  ;;  %v64_v53 = vld [vmem:[#allocation2 + $0x118] sm:$0xff]  ;;  %v63_v58 = vld [vmem:[#allocation2 + $0x110] sm:$0xff]  ;;  %v78_v62 = vld [vmem:[#allocation2 + $0x188] sm:$0xff]  ;;  %v106_v10 = vrot.slane %v28_v59, %v105_v0 }
  0x21   :  { %314 = vmatpush3.msra.mxu1 %v68_v35  ;;  %280 = vmatprep.subr.mxu0 %v51_v36  ;;  %v30_v1 = vld [vmem:[#allocation2 + $0x8] sm:$0xff]  ;;  %v45_v3 = vld [vmem:[#allocation2 + $0x80] sm:$0xff] }
  0x22   :  { %315 = vmatprep.subr.mxu1 %v83_v37  ;;  %281 = vmatpush3.msra.mxu0 %v35_v39  ;;  %v62_v2 = vld [vmem:[#allocation2 + $0x108] sm:$0xff]  ;;  %v77_v4 = vld [vmem:[#allocation2 + $0x180] sm:$0xff] }
  0x23   :  { %316 = vmatpush3.msra.mxu1 %v67_v40  ;;  %282 = vmatprep.subr.mxu0 %v50_v41  ;;  %v29_v6 = vld [vmem:[#allocation2] sm:$0xff] }
  0x24   :  { %317 = vmatprep.subr.mxu1 %v82_v42  ;;  %283 = vmatpush3.msra.mxu0 %v34_v43  ;;  %v61_v8 = vld [vmem:[#allocation2 + $0x100] sm:$0xff] }
  0x25   :  { %318 = vmatpush3.msra.mxu1 %v66_v44  ;;  %284 = vmatprep.subr.mxu0 %v49_v45  ;;  %v93_v13 = vld [vmem:[%s394_s2] sm:$0x1] }
  0x26   :  { %319 = vmatprep.subr.mxu1 %v81_v46  ;;  %285 = vmatpush3.msra.mxu0 %v33_v48 }
  0x27   :  { %320 = vmatpush3.msra.mxu1 %v65_v49  ;;  %286 = vmatprep.subr.mxu0 %v48_v50 }
  0x28   :  { %321 = vmatprep.subr.mxu1 %v80_v51  ;;  %287 = vmatpush3.msra.mxu0 %v32_v52 }
  0x29   :  { %322 = vmatpush3.msra.mxu1 %v64_v53  ;;  %288 = vmatprep.subr.mxu0 %v47_v54 }
  0x2a   :  { %323 = vmatprep.subr.mxu1 %v79_v55  ;;  %289 = vmatpush3.msra.mxu0 %v31_v57 }
  0x2b   :  { %324 = vmatpush3.msra.mxu1 %v63_v58  ;;  %290 = vmatprep.subr.mxu0 %v46_v61 }
  0x2c   :  { %325 = vmatprep.subr.mxu1 %v78_v62  ;;  %291 = vmatpush3.msra.mxu0 %v30_v1 }
  0x2d   :  { %326 = vmatpush3.msra.mxu1 %v62_v2  ;;  %292 = vmatprep.subr.mxu0 %v45_v3 }
  0x2e   :  { %327 = vmatprep.subr.mxu1 %v77_v4  ;;  %293 = vmatpush3.msra.mxu0 %v29_v6 }
  0x2f   :  { %179 = vmatprep.mubr.f32.mxu0 %v102_v5  ;;  %328 = vmatpush3.msra.mxu1 %v61_v8 }
  0x30   :  { %249 = vmatprep.mubr.f32.mxu1 %v110_v7  ;;  %180 = vmatmul.mubr.f32.vlgmr.msra.gmra.mxu0 %v98_v9 }
  0x31   :  { %250 = vmatmul.mubr.f32.vlgmr.msra.gmra.mxu1 %v106_v10 }
  0xf0   :  { %v294_v11 = vpop.f32.mrf.mxu0 }
  0xf1   :  { %v329_v12 = vpop.f32.mrf.mxu1 }
  0xf2   :  { %v295_v14 = vpop.f32.mrf.mxu0 }
  0xf3   :  { %v330_v15 = vpop.f32.mrf.mxu1  ;;  %v296_v16 = vadd.f32 %v295_v14, %v294_v11 }
  0xf4   :  { %v331_v18 = vadd.f32 %v330_v15, %v329_v12 }
  0xf5   :  { %v182_v17 = vadd.f32 %v296_v16, %v93_v13 }
  0xf7   :  { %v252_v19 = vadd.f32 %v331_v18, %v182_v17 }
  0xf9   :  { %v255_v20 = vmax.f32 %v252_v19, 0.0 }
  0xfb   :  { %256 = vst [vmem:[%s395_s3] sm:$0x1] %v255_v20 }
  0xfc   :  { %261 = vsyncpa [#allocation3], 1 }

</bundles_post_ra>
